<compile_context>
chip_gen: v5e
topology: v5e:2x2
jax: 0.10.0
libtpu: 0.0.40
codegen_flags: <defaults>
</compile_context>

<pallas_src>
import jax
import jax.numpy as jnp
from jax.experimental import pallas as pl
from jax.experimental.pallas import tpu as pltpu

LANE = 128     # last block dim must be a multiple of 128
SUBLANE = 8    # second-to-last block dim must be a multiple of 8


def _round_up(x, m):
    return (x + m - 1) // m * m


def _vmem_capacity_bytes():
    # Per-generation physical VMEM (v5e/v6e: 128 MiB, v7x per-TC: 64 MiB).
    try:
        return int(pltpu.get_tpu_info().vmem_capacity_bytes)
    except Exception:
        return 64 << 20  # conservative fallback (v7x per-TC VMEM)


def score_kernel(x_ref, wc_ref, bc_ref, o_ref):
    # Single fused matmul on the folded weight, f32 accumulation.
    x = x_ref[...].astype(wc_ref.dtype)          # in-kernel cast: VPU filler
    z = jnp.dot(x, wc_ref[...], preferred_element_type=jnp.float32) + bc_ref[...]
    # Sigmoid: exp and approx reciprocal both run on the EUP slot, keeping the
    # VALU free under the matmul / stores.
    o_ref[...] = (pl.reciprocal(1.0 + jnp.exp(-z), approx=True)).astype(o_ref.dtype)


def prepare_score_params(w1_t, b1, w2_t, b2, *, compute_dtype=jnp.bfloat16):
    """One-time weight prep: fold the two linears (f32), pad to lane multiples,
    cast the folded weight to the MXU dtype.

    w1_t: (in_f, in_f)  first linear weight, pre-transposed  (x @ w1_t == x @ W1.T)
    b1:   (in_f,)
    w2_t: (in_f, out_f) second linear weight, pre-transposed
    b2:   (out_f,)

    Returns (wc_p, bc_p):
      wc_p: (in_p, out_p) compute_dtype   folded weight, zero-padded
      bc_p: (1, out_p)    float32         folded bias, zero-padded
    Cache and reuse these; there is no per-forward-call weight traffic.
    """
    in_f = w1_t.shape[0]
    out_f = w2_t.shape[1]
    in_p = _round_up(in_f, LANE)
    out_p = _round_up(out_f, LANE)

    w1_f = w1_t.astype(jnp.float32)
    w2_f = w2_t.astype(jnp.float32)
    # Fold in full f32: z = x @ (W1^T @ W2^T) + (b1 @ W2^T + b2)
    wc = jnp.dot(w1_f, w2_f, preferred_element_type=jnp.float32)       # (in_f, out_f)
    bc = jnp.dot(b1.astype(jnp.float32), w2_f) + b2.astype(jnp.float32)  # (out_f,)

    wc_p = jnp.zeros((in_p, out_p), compute_dtype).at[:in_f, :out_f].set(
        wc.astype(compute_dtype))
    bc_p = jnp.zeros((1, out_p), jnp.float32).at[0, :out_f].set(bc)
    return wc_p, bc_p


def score_forward(x, wc_p, bc_p, out_f, *, tile_b=None):
    """Sigmoid(x @ Wc + bc) as one Pallas TPU kernel.

    x:     (B, in_f) activations (any float dtype; cast in-kernel)
    wc_p:  (in_p, out_p) folded weight from prepare_score_params
    bc_p:  (1, out_p) folded bias (f32)
    out_f: true (unpadded) output feature count
    Returns (B, out_f) in x.dtype.
    """
    B, in_f = x.shape
    in_p, out_p = wc_p.shape
    assert in_f <= in_p and out_f <= out_p

    xb = x.dtype.itemsize
    bpe = jnp.dtype(wc_p.dtype).itemsize
    ob = x.dtype.itemsize  # output dtype == x.dtype

    cap = _vmem_capacity_bytes()
    budget = int(cap * 0.75)

    def vmem_est(tb):
        return (2 * tb * in_p * xb          # double-buffered x tiles
                + tb * in_p * bpe           # in-kernel bf16 copy of x
                + 2 * tb * out_p * ob       # double-buffered out tiles
                + tb * out_p * 4            # f32 pre-sigmoid intermediate
                + 2 * in_p * out_p * bpe    # double-buffered folded weight
                + 2 * out_p * 4)            # bias

    # Batch tile: biggest 8-aligned tile (<= 1024) that fits the VMEM budget.
    if tile_b is None:
        tile_b = min(1024, _round_up(B, SUBLANE))
        while tile_b > SUBLANE and vmem_est(tile_b) > budget:
            tile_b = max(SUBLANE, _round_up(tile_b // 2, SUBLANE))
    assert tile_b % SUBLANE == 0, "tile_b must be a multiple of 8 (sublane width)"

    b_pad = _round_up(B, tile_b)
    grid_b = b_pad // tile_b
    # v7x has two TensorCores: keep the number of "parallel" grid steps even
    # (when >1) so the batch axis shards evenly.  v5e/v6e are unaffected.
    if grid_b > 1 and grid_b % 2 == 1:
        grid_b += 1
        b_pad = grid_b * tile_b

    # Activation prep: feed x directly when already tile-aligned (no per-call
    # pad/cast copy); otherwise zero-pad in x's own dtype (exact for affine).
    if b_pad == B and in_p == in_f:
        x_in = x
    else:
        x_in = jnp.zeros((b_pad, in_p), x.dtype).at[:B, :in_f].set(x)

    est = vmem_est(tile_b)
    cap_limit = max(budget, int(1.25 * est))   # never clamp below what we need
    vmem_limit = int(min(max(int(1.25 * est), 16 << 20), cap_limit))

    cost = pl.CostEstimate(
        flops=2 * b_pad * in_p * out_p,
        transcendentals=b_pad * out_p,
        bytes_accessed=(b_pad * in_p * xb + in_p * out_p * bpe
                        + out_p * 4 + b_pad * out_p * ob))

    out_padded = pl.pallas_call(
        score_kernel,
        out_shape=jax.ShapeDtypeStruct((b_pad, out_p), x.dtype),
        grid_spec=pltpu.PrefetchScalarGridSpec(
            num_scalar_prefetch=0,
            grid=(grid_b,),
            in_specs=[
                pl.BlockSpec((tile_b, in_p), lambda i: (i, 0)),   # x tile
                pl.BlockSpec((in_p, out_p), lambda i: (0, 0)),    # folded W
                pl.BlockSpec((1, out_p), lambda i: (0, 0)),       # folded bias
            ],
            out_specs=pl.BlockSpec((tile_b, out_p), lambda i: (i, 0)),
        ),
        compiler_params=pltpu.CompilerParams(
            dimension_semantics=("parallel",),
            vmem_limit_bytes=vmem_limit),
        cost_estimate=cost,
    )(x_in, wc_p, bc_p)

    return out_padded[:B, :out_f]


def init_params(key, in_features, out_features):
    """Deterministic init mimicking nn.Linear default (uniform(-1/sqrt(fan_in)))."""
    k1, k2, k3, k4 = jax.random.split(key, 4)
    bound1 = 1.0 / jnp.sqrt(in_features)
    # PyTorch Linear weight is (out, in); we store transposed (in, out).
    w1_t = jax.random.uniform(k1, (in_features, in_features),
                              minval=-bound1, maxval=bound1, dtype=jnp.float32)
    b1 = jax.random.uniform(k2, (in_features,),
                            minval=-bound1, maxval=bound1, dtype=jnp.float32)
    bound2 = 1.0 / jnp.sqrt(in_features)
    w2_t = jax.random.uniform(k3, (in_features, out_features),
                              minval=-bound2, maxval=bound2, dtype=jnp.float32)
    b2 = jax.random.uniform(k4, (out_features,),
                            minval=-bound2, maxval=bound2, dtype=jnp.float32)
    return w1_t, b1, w2_t, b2


def score_ref_f32(x, w1_t, b1, w2_t, b2):
    """Full-precision two-linear reference matching the PyTorch module."""
    h = x @ w1_t + b1
    z = h @ w2_t + b2
    return jax.nn.sigmoid(z)


if __name__ == "__main__":
    B, in_features, out_features = 8, 32, 16
    key = jax.random.PRNGKey(0)
    kx, kp = jax.random.split(key)
    x = jax.random.normal(kx, (B, in_features), dtype=jnp.float32)
    w1_t, b1, w2_t, b2 = init_params(kp, in_features, out_features)

    # One-time weight prep (fold + pad + cast), then the fused kernel.
    wc_p, bc_p = prepare_score_params(w1_t, b1, w2_t, b2)
    out = score_forward(x, wc_p, bc_p, out_features)
    out = jax.block_until_ready(out)

    ref = score_ref_f32(x, w1_t, b1, w2_t, b2)
    assert out.shape == (B, out_features)
    # bf16 folded weight + bf16 x + approx reciprocal -> loose-but-safe
    # tolerance vs the f32 two-matmul reference.
    assert jnp.allclose(out, ref, atol=2e-2, rtol=0.0), float(
        jnp.max(jnp.abs(out - ref)))

    print("KERNEL_OK")
</pallas_src>

<mosaic_0001>
module attributes {stable_mosaic.version = 11 : i64} {
  func.func @score_kernel(%arg0: i32, %arg1: memref<8x128xf32, #tpu.memory_space<vmem>>, %arg2: memref<128x128xbf16, #tpu.memory_space<vmem>>, %arg3: memref<1x128xf32, #tpu.memory_space<vmem>>, %arg4: memref<8x128xf32, #tpu.memory_space<vmem>>) attributes {dimension_semantics = [#tpu.dimension_semantics<parallel>], iteration_bounds = array<i64: 1>, scalar_prefetch = 0 : i64, scratch_operands = 0 : i64, tpu.core_type = #tpu.core_type<tc>, window_params = [{transform_indices = @transform_0, window_bounds = array<i64: 8, 128>}, {pipeline_mode = #tpu.pipeline_mode<synchronous>, transform_indices = @transform_1, window_bounds = array<i64: 128, 128>}, {pipeline_mode = #tpu.pipeline_mode<synchronous>, transform_indices = @transform_2, window_bounds = array<i64: 1, 128>}, {transform_indices = @transform_3, window_bounds = array<i64: 8, 128>}]} {
    %c0 = arith.constant 0 : index
    %c0_0 = arith.constant 0 : index
    %0 = vector.load %arg1[%c0, %c0_0] : memref<8x128xf32, #tpu.memory_space<vmem>>, vector<8x128xf32>
    %1 = arith.truncf %0 : vector<8x128xf32> to vector<8x128xbf16>
    %c0_1 = arith.constant 0 : index
    %c0_2 = arith.constant 0 : index
    %2 = vector.load %arg2[%c0_1, %c0_2] : memref<128x128xbf16, #tpu.memory_space<vmem>>, vector<128x128xbf16>
    %cst = arith.constant dense<0.000000e+00> : vector<8x128xf32>
    %3 = tpu.matmul %1, %2, %cst {dimension_numbers = #tpu.dot_dimension_numbers<[1], [0], [0], [1], [0, 0, 1, 1], [], []>} : vector<8x128xbf16>, vector<128x128xbf16>, vector<8x128xf32> -> vector<8x128xf32>
    %c0_3 = arith.constant 0 : index
    %c0_4 = arith.constant 0 : index
    %4 = vector.load %arg3[%c0_3, %c0_4] : memref<1x128xf32, #tpu.memory_space<vmem>>, vector<1x128xf32>
    %5 = vector.broadcast %4 : vector<1x128xf32> to vector<8x128xf32>
    %6 = arith.addf %3, %5 : vector<8x128xf32>
    %cst_5 = arith.constant 0.000000e+00 : f32
    %7 = vector.broadcast %cst_5 : f32 to vector<8x128xf32>
    %8 = arith.subf %7, %6 : vector<8x128xf32>
    %9 = math.exp %8 : vector<8x128xf32>
    %cst_6 = arith.constant 1.000000e+00 : f32
    %10 = vector.broadcast %cst_6 : f32 to vector<8x128xf32>
    %11 = arith.addf %10, %9 : vector<8x128xf32>
    %12 = tpu.reciprocal %11 {approx = true} : vector<8x128xf32> -> vector<8x128xf32>
    %c0_7 = arith.constant 0 : index
    %c0_8 = arith.constant 0 : index
    %13 = vector.load %arg4[%c0_7, %c0_8] : memref<8x128xf32, #tpu.memory_space<vmem>>, vector<8x128xf32>
    tpu.vector_store %arg4[%c0_7, %c0_8], %12 {strides = array<i32>} : memref<8x128xf32, #tpu.memory_space<vmem>>, vector<8x128xf32>,
    return
  }
  func.func @transform_0(%arg0: i32) -> (i32, i32) {
    %c0_i32 = arith.constant 0 : i32
    %c0_i32_0 = arith.constant 0 : i32
    return %arg0, %c0_i32 : i32, i32
  }
  func.func @transform_1(%arg0: i32) -> (i32, i32) {
    %c0_i32 = arith.constant 0 : i32
    %c0_i32_0 = arith.constant 0 : i32
    %c0_i32_1 = arith.constant 0 : i32
    return %c0_i32, %c0_i32_0 : i32, i32
  }
  func.func @transform_2(%arg0: i32) -> (i32, i32) {
    %c0_i32 = arith.constant 0 : i32
    %c0_i32_0 = arith.constant 0 : i32
    %c0_i32_1 = arith.constant 0 : i32
    return %c0_i32, %c0_i32_0 : i32, i32
  }
  func.func @transform_3(%arg0: i32) -> (i32, i32) {
    %c0_i32 = arith.constant 0 : i32
    %c0_i32_0 = arith.constant 0 : i32
    return %arg0, %c0_i32 : i32, i32
  }
}

</mosaic_0001>

<bundles_post_ra>
// kernel: tpu_custom_call.1
= control target key start
LH: loop header
LB: loop body
LE: loop exit
PB: predicated region body
PF: predicated region fallthrough
CT: control target
= control target key end

     0   :  { %8 = vsyncpa [#allocation3], 0  ;;  %s317_s0 = inlined_call_operand.hbm [shape: f32[8,128], index: 0, kind: input, shape index: {}]   ;;  %s318_s1 = inlined_call_operand.hbm [shape: bf16[128,128], index: 1, kind: input, shape index: {}]   ;;  %s319_s2 = inlined_call_operand.vmem [shape: f32[1,128], index: 2, kind: input, shape index: {}]   ;;  %s320_s3 = inlined_call_operand.hbm [shape: f32[8,128], index: 3, kind: output, shape index: {}]  }
   0x1   :  { %9 = vsyncpa [#allocation6], 0 }
   0x2   :  { %10 = vsyncpa [#allocation4], 0  ;;  %s16_s14 = sshll.u32 %s317_s0, 4  ;;  %s280_s15 = smov [#allocation2]   ;;  %s17_s14 = int_to_ptr.hbm [resolvable:$true] %s16_s14 }
   0x3   :  { %s18_s16 = sshll.u32 %s280_s15, 4  ;;  %s26_s19 = sshll.u32 %s318_s1, 4  ;;  %s19_s16 = int_to_ptr.vmem [resolvable:$true] %s18_s16  ;;  %s27_s19 = int_to_ptr.hbm [resolvable:$true] %s26_s19 }
   0x4   :  { %21 = dma.hbm_to_vmem [thread:$0]  %s17_s14, 128, %s19_s16, [#allocation3]  }
   0x5   :  { %s281_s20 = smov [#allocation5]   ;;  %s282_s22 = smov 64  }
   0x6   :  { %s28_s21 = sshll.u32 %s281_s20, 4  ;;  %s283_s23 = smov 4   ;;  %s29_s21 = int_to_ptr.vmem [resolvable:$true] %s28_s21 }
   0x7   :  { %34 = dma.hbm_to_vmem [thread:$0]  %s27_s19, 1024, %s29_s21, [#allocation6], %s282_s22, %s282_s22, %s283_s23  }
   0x8   :  { %274 = dma.done.wait [#allocation3], 128  }
   0x9   :  { %275 = vsyncadd [#allocation3], 4294967168 }
   0xa   :  { %276 = dma.done.wait [#allocation6], 1024  }
   0xb   :  { %277 = vsyncadd [#allocation6], 4294966272  ;;  %v191_v0 = vld [vmem:[#allocation5 + $0x38] sm:$0xff]  ;;  %v190_v1 = vld [vmem:[#allocation5 + $0x30] sm:$0xff]  ;;  %s284_s24 = smov [#allocation7]   ;;  %s141_s28 = sshll.u32 %s320_s3, 4  ;;  %s142_s28 = int_to_ptr.hbm [resolvable:$true] %s141_s28 }
   0xc   :  { %115 = vmatpush.bf16.msra.mxu0 %v191_v0  ;;  %v189_v2 = vld [vmem:[#allocation5 + $0x28] sm:$0xff]  ;;  %v188_v3 = vld [vmem:[#allocation5 + $0x20] sm:$0xff]  ;;  %v187_v4 = vld [vmem:[#allocation5 + $0x18] sm:$0xff]  ;;  %s139_s25 = sshll.u32 %s284_s24, 4  ;;  %s140_s25 = int_to_ptr.vmem [resolvable:$true] %s139_s25 }
   0xd   :  { %v186_v5 = vld [vmem:[#allocation5 + $0x10] sm:$0xff]  ;;  %v185_v6 = vld [vmem:[#allocation5 + $0x8] sm:$0xff]  ;;  %v184_v7 = vld [vmem:[#allocation5] sm:$0xff] }
   0xe   :  { %v45_v8 = vld [vmem:[#allocation2] sm:$0xff] }
   0xf   :  { %v46_v9 = vpack.c.bf16 %v45_v8, %v45_v8  ;;  %v197_v10 = vld [vmem:[%s319_s2] ss:$0 sm:$0xff] }
  0x10   :  { %116 = vmatpush.bf16.msra.mxu0 %v190_v1 }
  0x14   :  { %117 = vmatpush.bf16.msra.mxu0 %v189_v2 }
  0x18   :  { %118 = vmatpush.bf16.msra.mxu0 %v188_v3 }
  0x1c   :  { %119 = vmatpush.bf16.msra.mxu0 %v187_v4 }
  0x20   :  { %120 = vmatpush.bf16.msra.mxu0 %v186_v5 }
  0x24   :  { %121 = vmatpush.bf16.msra.mxu0 %v185_v6 }
  0x28   :  { %122 = vmatpush.bf16.msra.mxu0 %v184_v7 }
  0x2b   :  { %123 = vmatmul.bf16.vlgmr.msra.gmra.mxu0 %v46_v9 }
  0xa8   :  { %v124_v11 = vpop.f32.mrf.mxu0 }
  0xa9   :  { %v125_v12 = vadd.f32 %v197_v10, %v124_v11 }
  0xab   :  { %v128_v13 = vsub.f32 0.0, %v125_v12 }
  0xad   :  { %v129_v14 = vmul.f32 1.442695, %v128_v13 }
  0xaf   :  { %198 = vpow2.f32 %v129_v14 }
  0xb0   :  { %v126_v15 = vpop.f32.mrf.mxu0 }
  0xb5   :  { %v199_v16 = vpop.eup %198 }
  0xb6   :  { %v131_v17 = vadd.f32 1.0, %v199_v16 }
  0xb8   :  { %200 = vrcp.f32 %v131_v17 }
  0xbe   :  { %v201_v18 = vpop.eup %200 }
  0xbf   :  { %133 = vst [vmem:[#allocation7] sm:$0xff] %v201_v18 }
  0xc0   :  { %144 = dma.vmem_to_hbm [thread:$0]  %s140_s25, 128, %s142_s28, [#allocation4]  }
  0xc1   :  { %278 = dma.done.wait [#allocation4], 128  }
  0xc2   :  { %279 = vsyncadd [#allocation4], 4294967168 }
  0xc3   :  { %149 = vsyncpa [#allocation3], 1 }
  0xc4   :  { %150 = vsyncpa [#allocation6], 1 }
  0xc5   :  { %151 = vsyncpa [#allocation4], 1 }

</bundles_post_ra>
